<compile_context>
chip_gen: v7x
topology: tpu7x:2x2x1
jax: 0.10.0
libtpu: 0.0.40
codegen_flags: <defaults>
</compile_context>

<pallas_src>
import jax
import jax.numpy as jnp
from jax import lax
from jax.experimental import pallas as pl
from jax.experimental.pallas import tpu as pltpu

EPS = 1e-5
K = 3        # kernel_size
PAD = 1      # padding (stride fixed to 1, the module default)
LANE = 128   # TPU lane width


def _round_up(x, m):
    return (x + m - 1) // m * m


def _make_resblock_kernel(N, L, cin_lane, cout_p, Cin, has_downsample, packed):
    NL = N * L
    inv_nl = 1.0 / float(NL)

    def bn_fold(y, g, b):
        # training-mode BatchNorm1d folded to a per-channel scale/shift.
        # Centered (two-pass) variance, all stats in f32.
        m = jnp.sum(y, axis=0, keepdims=True) * inv_nl
        d = y - m
        v = jnp.sum(d * d, axis=0, keepdims=True) * inv_nl
        scale = g * lax.rsqrt(v + EPS)                      # rsqrt -> EUP slot
        return scale, b - m * scale

    def kernel(*refs):
        it = iter(refs)
        x_ref = next(it)
        w1_ref = next(it)
        wd_ref = next(it) if (has_downsample and not packed) else None
        w2_ref = next(it)
        mprev_ref = next(it)
        mnext_ref = next(it)
        g1_ref = next(it); b1_ref = next(it)
        g2_ref = next(it); b2_ref = next(it)
        if has_downsample:
            gd_ref = next(it); bd_ref = next(it)
        out_ref = next(it)

        x = x_ref[...]                                      # (NL, cin_lane) f32
        mprev = mprev_ref[...]                              # (NL, 1) f32: 0 where l == 0
        mnext = mnext_ref[...]                              # (NL, 1) f32: 0 where l == L-1

        # ---- conv1 taps built in-registers (roll -> XLU, mask -> VPU) -------
        # A global row roll only leaks across batch boundaries at exactly the
        # conv zero-pad rows, which the masks zero out.
        x_prev = pltpu.roll(x, shift=1, axis=0) * mprev
        x_next = pltpu.roll(x, shift=NL - 1, axis=0) * mnext

        if packed:
            # K*Cin <= 128: lane-roll the taps into one packed 128-lane
            # contraction (wraparound lanes are x's zero pad lanes).
            xcol = (x_prev
                    + pltpu.roll(x, shift=Cin, axis=1)
                    + pltpu.roll(x_next, shift=2 * Cin, axis=1))
            acc = jnp.dot(xcol.astype(jnp.bfloat16), w1_ref[...],
                          preferred_element_type=jnp.float32)
            y1 = acc[:, :cout_p]
            r = acc[:, cout_p:2 * cout_p] if has_downsample else x
        else:
            xp = x_prev.astype(jnp.bfloat16)
            xc = x.astype(jnp.bfloat16)
            xn = x_next.astype(jnp.bfloat16)
            y1 = (jnp.dot(xp, w1_ref[0], preferred_element_type=jnp.float32)
                  + jnp.dot(xc, w1_ref[1], preferred_element_type=jnp.float32)
                  + jnp.dot(xn, w1_ref[2], preferred_element_type=jnp.float32))
            if has_downsample:
                r = jnp.dot(xc, wd_ref[...], preferred_element_type=jnp.float32)
            else:
                r = x                                      # identity shortcut, f32

        # ---- BN1 + ReLU: one fused elementwise pass (f32) --------------------
        s1, t1 = bn_fold(y1, g1_ref[...], b1_ref[...])
        h = jnp.maximum(y1 * s1 + t1, 0.0)                 # (NL, cout_p) f32

        # ---- conv2: three accumulating matmuls (no lane-concat hcol buffer) --
        h_prev = (pltpu.roll(h, shift=1, axis=0) * mprev).astype(jnp.bfloat16)
        h_next = (pltpu.roll(h, shift=NL - 1, axis=0) * mnext).astype(jnp.bfloat16)
        y2 = (jnp.dot(h_prev, w2_ref[0], preferred_element_type=jnp.float32)
              + jnp.dot(h.astype(jnp.bfloat16), w2_ref[1],
                        preferred_element_type=jnp.float32)
              + jnp.dot(h_next, w2_ref[2], preferred_element_type=jnp.float32))

        # ---- BN2 (+ downsample BN) + residual add + ReLU: one fused pass -----
        s2, t2 = bn_fold(y2, g2_ref[...], b2_ref[...])
        if has_downsample:
            sd, td = bn_fold(r, gd_ref[...], bd_ref[...])
            out = jnp.maximum(y2 * s2 + r * sd + (t2 + td), 0.0)
        else:
            out = jnp.maximum(y2 * s2 + t2 + r, 0.0)

        out_ref[...] = out                                  # (NL, cout_p) lane-dense

    return kernel


def resblock_forward(x, params, *, channels_last_out=False):
    """x: (N, Cin, L) float32, PyTorch NCW layout. Returns (N, Cout, L)
    (or (N, L, Cout) if channels_last_out, skipping the output transpose pass)."""
    w1, g1, b1, w2, g2, b2, wd, gd, bd = params
    N, Cin, L = x.shape
    Cout = w1.shape[0]
    has_downsample = (Cin != Cout)            # stride == 1 in this kernel
    packed = (K * Cin) <= LANE                # pack all taps into one 128-lane contraction
    cin_lane = LANE if packed else _round_up(Cin, LANE)
    cout_p = _round_up(Cout, LANE)
    NL = N * L
    f32, bf16 = jnp.float32, jnp.bfloat16

    # ---- activations: NCW -> NLC, lane-pad channels (single layout pass) -----
    # TODO(synk): accept NLC input directly when the producing op allows it, so
    # this transpose does not cost a standalone HBM pass.
    x_nlc = jnp.transpose(x, (0, 2, 1)).astype(f32)                    # (N, L, Cin)
    x_pad = jnp.pad(x_nlc, ((0, 0), (0, 0), (0, cin_lane - Cin))).reshape(NL, cin_lane)

    # ---- weights (bf16 for the MXU; taps stacked along the contraction axis) -
    w1_t = jnp.transpose(w1, (2, 1, 0)).astype(f32)                    # (K, Cin, Cout)
    w2_t = jnp.transpose(w2, (2, 1, 0)).astype(f32)                    # (K, Cout, Cout)
    w2_p = jnp.pad(w2_t, ((0, 0), (0, cout_p - Cout), (0, cout_p - Cout))).astype(bf16)

    def pad_vec(v):
        return jnp.pad(v.astype(f32), (0, cout_p - Cout)).reshape(1, cout_p)

    args = [x_pad]
    if packed:
        # pack K*Cin contiguously, pad total contraction to 128 lanes
        w1_pk = jnp.pad(w1_t.reshape(K * Cin, Cout),
                        ((0, LANE - K * Cin), (0, cout_p - Cout)))
        if has_downsample:
            # fuse the 1x1 downsample conv as extra output columns (middle tap rows)
            wd_pk = jnp.zeros((LANE, cout_p), f32)
            wd_pk = wd_pk.at[Cin:2 * Cin, :Cout].set(jnp.transpose(wd[:, :, 0]).astype(f32))
            w1_pk = jnp.concatenate([w1_pk, wd_pk], axis=1)            # (128, 2*cout_p)
        args.append(w1_pk.astype(bf16))
    else:
        w1_p = jnp.pad(w1_t, ((0, 0), (0, cin_lane - Cin), (0, cout_p - Cout))).astype(bf16)
        args.append(w1_p)
        if has_downsample:
            wd_p = jnp.pad(jnp.transpose(wd[:, :, 0]).astype(f32),
                           ((0, cin_lane - Cin), (0, cout_p - Cout))).astype(bf16)
            args.append(wd_p)
    args.append(w2_p)

    # narrow (NL, 1) boundary masks for the conv zero-padding rows
    pos = jnp.arange(NL) % L
    mask_prev = (pos != 0).astype(f32).reshape(NL, 1)
    mask_next = (pos != (L - 1)).astype(f32).reshape(NL, 1)
    args += [mask_prev, mask_next]

    args += [pad_vec(g1), pad_vec(b1), pad_vec(g2), pad_vec(b2)]
    if has_downsample:
        args += [pad_vec(gd), pad_vec(bd)]

    # TODO(synk): for production-sized N*L (esp. v7x's 64 MiB VMEM), tile over a
    # grid of NL row-tiles ("parallel" for the 2 v7x TensorCores) with a
    # two-pass BN (per-tile sum/sumsq accumulated in a constant-index_map
    # scratch on an "arbitrary" axis, then an apply pass); kept one
    # VMEM-resident invocation here since training-mode BN needs global batch
    # statistics and the example shapes are tiny.
    kernel = _make_resblock_kernel(N, L, cin_lane, cout_p, Cin, has_downsample, packed)
    out_p = pl.pallas_call(
        kernel,
        out_shape=jax.ShapeDtypeStruct((NL, cout_p), f32),
        in_specs=[pl.BlockSpec(memory_space=pltpu.MemorySpace.VMEM)] * len(args),
        out_specs=pl.BlockSpec(memory_space=pltpu.MemorySpace.VMEM),
        # ~48 MiB: above the 16/32 MiB scoped defaults, below v7x's 64 MiB
        # physical; size up toward ~100 MiB on v5e/v6e for larger batches.
        compiler_params=pltpu.CompilerParams(vmem_limit_bytes=48 * 1024 * 1024),
    )(*args)

    out_nlc = out_p.reshape(N, L, cout_p)[:, :, :Cout]                 # wrapper-side reshape/slice
    if channels_last_out:
        return out_nlc                                                  # skip the NLC->NCW pass
    return jnp.transpose(out_nlc, (0, 2, 1))                           # (N, Cout, L)


def ref_forward(x, params):
    """Pure-JAX f32 reference with the PyTorch module's semantics."""
    w1, g1, b1, w2, g2, b2, wd, gd, bd = params

    def conv(y, w, padding):
        return lax.conv_general_dilated(
            y, w, window_strides=(1,), padding=[(padding, padding)],
            dimension_numbers=('NCH', 'OIH', 'NCH'))

    def bn(y, g, b):
        m = jnp.mean(y, axis=(0, 2), keepdims=True)
        v = jnp.mean((y - m) ** 2, axis=(0, 2), keepdims=True)
        return (y - m) / jnp.sqrt(v + EPS) * g.reshape(1, -1, 1) + b.reshape(1, -1, 1)

    out = jnp.maximum(bn(conv(x, w1, PAD), g1, b1), 0.0)
    out = bn(conv(out, w2, PAD), g2, b2)
    res = bn(conv(x, wd, 0), gd, bd)
    return jnp.maximum(out + res, 0.0)


if __name__ == "__main__":
    N, Cin, Cout, L = 2, 4, 8, 16

    key = jax.random.PRNGKey(0)
    ks = jax.random.split(key, 8)
    x = jax.random.normal(ks[0], (N, Cin, L), jnp.float32)

    # deterministic synthetic parameters (shapes per nn.Conv1d / nn.BatchNorm1d)
    w1 = 0.1 * jax.random.normal(ks[1], (Cout, Cin, K), jnp.float32)   # conv1.weight
    w2 = 0.1 * jax.random.normal(ks[2], (Cout, Cout, K), jnp.float32)  # conv2.weight
    wd = 0.1 * jax.random.normal(ks[3], (Cout, Cin, 1), jnp.float32)   # downsample conv weight
    g1 = 1.0 + 0.1 * jax.random.normal(ks[4], (Cout,), jnp.float32)    # bn1.weight
    b1 = 0.1 * jax.random.normal(ks[5], (Cout,), jnp.float32)          # bn1.bias
    g2 = 1.0 + 0.1 * jax.random.normal(ks[6], (Cout,), jnp.float32)    # bn2.weight
    b2 = 0.1 * jax.random.normal(ks[7], (Cout,), jnp.float32)          # bn2.bias
    gd = jnp.ones((Cout,), jnp.float32)                                # downsample bn weight
    bd = jnp.zeros((Cout,), jnp.float32)                               # downsample bn bias

    params = (w1, g1, b1, w2, g2, b2, wd, gd, bd)

    out = jax.block_until_ready(resblock_forward(x, params))
    ref = jax.block_until_ready(ref_forward(x, params))

    assert out.shape == (N, Cout, L)
    # bf16 MXU operands (f32 accumulate / f32 BN + residual) -> relaxed tolerance
    max_err = jnp.max(jnp.abs(out - ref))
    assert jnp.allclose(out, ref, atol=6e-2, rtol=6e-2), f"max abs err {max_err}"

    print("KERNEL_OK")
</pallas_src>

<mosaic_0001>
module attributes {stable_mosaic.version = 11 : i64} {
  func.func @kernel(%arg0: memref<32x128xf32, #tpu.memory_space<vmem>>, %arg1: memref<128x256xbf16, #tpu.memory_space<vmem>>, %arg2: memref<3x128x128xbf16, #tpu.memory_space<vmem>>, %arg3: memref<32x1xf32, #tpu.memory_space<vmem>>, %arg4: memref<32x1xf32, #tpu.memory_space<vmem>>, %arg5: memref<1x128xf32, #tpu.memory_space<vmem>>, %arg6: memref<1x128xf32, #tpu.memory_space<vmem>>, %arg7: memref<1x128xf32, #tpu.memory_space<vmem>>, %arg8: memref<1x128xf32, #tpu.memory_space<vmem>>, %arg9: memref<1x128xf32, #tpu.memory_space<vmem>>, %arg10: memref<1x128xf32, #tpu.memory_space<vmem>>, %arg11: memref<32x128xf32, #tpu.memory_space<vmem>>) attributes {dimension_semantics = [], scalar_prefetch = 0 : i64, scratch_operands = 0 : i64, tpu.core_type = #tpu.core_type<tc>} {
    %c0 = arith.constant 0 : index
    %c0_0 = arith.constant 0 : index
    %0 = vector.load %arg0[%c0, %c0_0] : memref<32x128xf32, #tpu.memory_space<vmem>>, vector<32x128xf32>
    %c0_1 = arith.constant 0 : index
    %c0_2 = arith.constant 0 : index
    %1 = vector.load %arg3[%c0_1, %c0_2] : memref<32x1xf32, #tpu.memory_space<vmem>>, vector<32x1xf32>
    %c0_3 = arith.constant 0 : index
    %c0_4 = arith.constant 0 : index
    %2 = vector.load %arg4[%c0_3, %c0_4] : memref<32x1xf32, #tpu.memory_space<vmem>>, vector<32x1xf32>
    %c1_i32 = arith.constant 1 : i32
    %3 = tpu.dynamic_rotate %0 by %c1_i32 dim 0 : vector<32x128xf32>, i32 -> vector<32x128xf32>
    %4 = vector.broadcast %1 : vector<32x1xf32> to vector<32x128xf32>
    %5 = arith.mulf %3, %4 : vector<32x128xf32>
    %c31_i32 = arith.constant 31 : i32
    %6 = tpu.dynamic_rotate %0 by %c31_i32 dim 0 : vector<32x128xf32>, i32 -> vector<32x128xf32>
    %7 = vector.broadcast %2 : vector<32x1xf32> to vector<32x128xf32>
    %8 = arith.mulf %6, %7 : vector<32x128xf32>
    %c4_i32 = arith.constant 4 : i32
    %9 = tpu.dynamic_rotate %0 by %c4_i32 dim 1 : vector<32x128xf32>, i32 -> vector<32x128xf32>
    %10 = arith.addf %5, %9 : vector<32x128xf32>
    %c8_i32 = arith.constant 8 : i32
    %11 = tpu.dynamic_rotate %8 by %c8_i32 dim 1 : vector<32x128xf32>, i32 -> vector<32x128xf32>
    %12 = arith.addf %10, %11 : vector<32x128xf32>
    %13 = arith.truncf %12 : vector<32x128xf32> to vector<32x128xbf16>
    %c0_5 = arith.constant 0 : index
    %c0_6 = arith.constant 0 : index
    %14 = vector.load %arg1[%c0_5, %c0_6] : memref<128x256xbf16, #tpu.memory_space<vmem>>, vector<128x256xbf16>
    %cst = arith.constant dense<0.000000e+00> : vector<32x256xf32>
    %15 = tpu.matmul %13, %14, %cst {dimension_numbers = #tpu.dot_dimension_numbers<[1], [0], [0], [1], [0, 0, 1, 1], [], []>} : vector<32x128xbf16>, vector<128x256xbf16>, vector<32x256xf32> -> vector<32x256xf32>
    %16 = vector.extract_strided_slice %15 {offsets = [0, 0], sizes = [32, 128], strides = [1, 1]} : vector<32x256xf32> to vector<32x128xf32>
    %17 = vector.extract_strided_slice %15 {offsets = [0, 128], sizes = [32, 128], strides = [1, 1]} : vector<32x256xf32> to vector<32x128xf32>
    %c0_7 = arith.constant 0 : index
    %c0_8 = arith.constant 0 : index
    %18 = vector.load %arg5[%c0_7, %c0_8] : memref<1x128xf32, #tpu.memory_space<vmem>>, vector<1x128xf32>
    %c0_9 = arith.constant 0 : index
    %c0_10 = arith.constant 0 : index
    %19 = vector.load %arg6[%c0_9, %c0_10] : memref<1x128xf32, #tpu.memory_space<vmem>>, vector<1x128xf32>
    %cst_11 = arith.constant dense<0.000000e+00> : vector<128xf32>
    %20 = vector.multi_reduction <add>, %16, %cst_11 [0] : vector<32x128xf32> to vector<128xf32>
    %21 = vector.shape_cast %20 : vector<128xf32> to vector<1x128xf32>
    %cst_12 = arith.constant 3.125000e-02 : f32
    %22 = vector.broadcast %cst_12 : f32 to vector<1x128xf32>
    %23 = arith.mulf %21, %22 : vector<1x128xf32>
    %24 = vector.broadcast %23 : vector<1x128xf32> to vector<32x128xf32>
    %25 = arith.subf %16, %24 : vector<32x128xf32>
    %26 = arith.mulf %25, %25 : vector<32x128xf32>
    %cst_13 = arith.constant dense<0.000000e+00> : vector<128xf32>
    %27 = vector.multi_reduction <add>, %26, %cst_13 [0] : vector<32x128xf32> to vector<128xf32>
    %28 = vector.shape_cast %27 : vector<128xf32> to vector<1x128xf32>
    %cst_14 = arith.constant 3.125000e-02 : f32
    %29 = vector.broadcast %cst_14 : f32 to vector<1x128xf32>
    %30 = arith.mulf %28, %29 : vector<1x128xf32>
    %cst_15 = arith.constant 9.99999974E-6 : f32
    %31 = vector.broadcast %cst_15 : f32 to vector<1x128xf32>
    %32 = arith.addf %30, %31 : vector<1x128xf32>
    %33 = math.rsqrt %32 : vector<1x128xf32>
    %34 = arith.mulf %18, %33 : vector<1x128xf32>
    %35 = arith.mulf %23, %34 : vector<1x128xf32>
    %36 = arith.subf %19, %35 : vector<1x128xf32>
    %37 = vector.broadcast %34 : vector<1x128xf32> to vector<32x128xf32>
    %38 = arith.mulf %16, %37 : vector<32x128xf32>
    %39 = vector.broadcast %36 : vector<1x128xf32> to vector<32x128xf32>
    %40 = arith.addf %38, %39 : vector<32x128xf32>
    %cst_16 = arith.constant 0.000000e+00 : f32
    %41 = vector.broadcast %cst_16 : f32 to vector<32x128xf32>
    %42 = arith.maximumf %40, %41 : vector<32x128xf32>
    %c1_i32_17 = arith.constant 1 : i32
    %43 = tpu.dynamic_rotate %42 by %c1_i32_17 dim 0 : vector<32x128xf32>, i32 -> vector<32x128xf32>
    %44 = vector.broadcast %1 : vector<32x1xf32> to vector<32x128xf32>
    %45 = arith.mulf %43, %44 : vector<32x128xf32>
    %46 = arith.truncf %45 : vector<32x128xf32> to vector<32x128xbf16>
    %c31_i32_18 = arith.constant 31 : i32
    %47 = tpu.dynamic_rotate %42 by %c31_i32_18 dim 0 : vector<32x128xf32>, i32 -> vector<32x128xf32>
    %48 = vector.broadcast %2 : vector<32x1xf32> to vector<32x128xf32>
    %49 = arith.mulf %47, %48 : vector<32x128xf32>
    %50 = arith.truncf %49 : vector<32x128xf32> to vector<32x128xbf16>
    %c0_19 = arith.constant 0 : index
    %c0_20 = arith.constant 0 : index
    %c0_21 = arith.constant 0 : index
    %51 = vector.load %arg2[%c0_19, %c0_20, %c0_21] : memref<3x128x128xbf16, #tpu.memory_space<vmem>>, vector<1x128x128xbf16>
    %52 = vector.shape_cast %51 : vector<1x128x128xbf16> to vector<128x128xbf16>
    %cst_22 = arith.constant dense<0.000000e+00> : vector<32x128xf32>
    %53 = tpu.matmul %46, %52, %cst_22 {dimension_numbers = #tpu.dot_dimension_numbers<[1], [0], [0], [1], [0, 0, 1, 1], [], []>} : vector<32x128xbf16>, vector<128x128xbf16>, vector<32x128xf32> -> vector<32x128xf32>
    %54 = arith.truncf %42 : vector<32x128xf32> to vector<32x128xbf16>
    %c1 = arith.constant 1 : index
    %c0_23 = arith.constant 0 : index
    %c0_24 = arith.constant 0 : index
    %55 = vector.load %arg2[%c1, %c0_23, %c0_24] : memref<3x128x128xbf16, #tpu.memory_space<vmem>>, vector<1x128x128xbf16>
    %56 = vector.shape_cast %55 : vector<1x128x128xbf16> to vector<128x128xbf16>
    %cst_25 = arith.constant dense<0.000000e+00> : vector<32x128xf32>
    %57 = tpu.matmul %54, %56, %cst_25 {dimension_numbers = #tpu.dot_dimension_numbers<[1], [0], [0], [1], [0, 0, 1, 1], [], []>} : vector<32x128xbf16>, vector<128x128xbf16>, vector<32x128xf32> -> vector<32x128xf32>
    %58 = arith.addf %53, %57 : vector<32x128xf32>
    %c2 = arith.constant 2 : index
    %c0_26 = arith.constant 0 : index
    %c0_27 = arith.constant 0 : index
    %59 = vector.load %arg2[%c2, %c0_26, %c0_27] : memref<3x128x128xbf16, #tpu.memory_space<vmem>>, vector<1x128x128xbf16>
    %60 = vector.shape_cast %59 : vector<1x128x128xbf16> to vector<128x128xbf16>
    %cst_28 = arith.constant dense<0.000000e+00> : vector<32x128xf32>
    %61 = tpu.matmul %50, %60, %cst_28 {dimension_numbers = #tpu.dot_dimension_numbers<[1], [0], [0], [1], [0, 0, 1, 1], [], []>} : vector<32x128xbf16>, vector<128x128xbf16>, vector<32x128xf32> -> vector<32x128xf32>
    %62 = arith.addf %58, %61 : vector<32x128xf32>
    %c0_29 = arith.constant 0 : index
    %c0_30 = arith.constant 0 : index
    %63 = vector.load %arg7[%c0_29, %c0_30] : memref<1x128xf32, #tpu.memory_space<vmem>>, vector<1x128xf32>
    %c0_31 = arith.constant 0 : index
    %c0_32 = arith.constant 0 : index
    %64 = vector.load %arg8[%c0_31, %c0_32] : memref<1x128xf32, #tpu.memory_space<vmem>>, vector<1x128xf32>
    %cst_33 = arith.constant dense<0.000000e+00> : vector<128xf32>
    %65 = vector.multi_reduction <add>, %62, %cst_33 [0] : vector<32x128xf32> to vector<128xf32>
    %66 = vector.shape_cast %65 : vector<128xf32> to vector<1x128xf32>
    %cst_34 = arith.constant 3.125000e-02 : f32
    %67 = vector.broadcast %cst_34 : f32 to vector<1x128xf32>
    %68 = arith.mulf %66, %67 : vector<1x128xf32>
    %69 = vector.broadcast %68 : vector<1x128xf32> to vector<32x128xf32>
    %70 = arith.subf %62, %69 : vector<32x128xf32>
    %71 = arith.mulf %70, %70 : vector<32x128xf32>
    %cst_35 = arith.constant dense<0.000000e+00> : vector<128xf32>
    %72 = vector.multi_reduction <add>, %71, %cst_35 [0] : vector<32x128xf32> to vector<128xf32>
    %73 = vector.shape_cast %72 : vector<128xf32> to vector<1x128xf32>
    %cst_36 = arith.constant 3.125000e-02 : f32
    %74 = vector.broadcast %cst_36 : f32 to vector<1x128xf32>
    %75 = arith.mulf %73, %74 : vector<1x128xf32>
    %cst_37 = arith.constant 9.99999974E-6 : f32
    %76 = vector.broadcast %cst_37 : f32 to vector<1x128xf32>
    %77 = arith.addf %75, %76 : vector<1x128xf32>
    %78 = math.rsqrt %77 : vector<1x128xf32>
    %79 = arith.mulf %63, %78 : vector<1x128xf32>
    %80 = arith.mulf %68, %79 : vector<1x128xf32>
    %81 = arith.subf %64, %80 : vector<1x128xf32>
    %c0_38 = arith.constant 0 : index
    %c0_39 = arith.constant 0 : index
    %82 = vector.load %arg9[%c0_38, %c0_39] : memref<1x128xf32, #tpu.memory_space<vmem>>, vector<1x128xf32>
    %c0_40 = arith.constant 0 : index
    %c0_41 = arith.constant 0 : index
    %83 = vector.load %arg10[%c0_40, %c0_41] : memref<1x128xf32, #tpu.memory_space<vmem>>, vector<1x128xf32>
    %cst_42 = arith.constant dense<0.000000e+00> : vector<128xf32>
    %84 = vector.multi_reduction <add>, %17, %cst_42 [0] : vector<32x128xf32> to vector<128xf32>
    %85 = vector.shape_cast %84 : vector<128xf32> to vector<1x128xf32>
    %cst_43 = arith.constant 3.125000e-02 : f32
    %86 = vector.broadcast %cst_43 : f32 to vector<1x128xf32>
    %87 = arith.mulf %85, %86 : vector<1x128xf32>
    %88 = vector.broadcast %87 : vector<1x128xf32> to vector<32x128xf32>
    %89 = arith.subf %17, %88 : vector<32x128xf32>
    %90 = arith.mulf %89, %89 : vector<32x128xf32>
    %cst_44 = arith.constant dense<0.000000e+00> : vector<128xf32>
    %91 = vector.multi_reduction <add>, %90, %cst_44 [0] : vector<32x128xf32> to vector<128xf32>
    %92 = vector.shape_cast %91 : vector<128xf32> to vector<1x128xf32>
    %cst_45 = arith.constant 3.125000e-02 : f32
    %93 = vector.broadcast %cst_45 : f32 to vector<1x128xf32>
    %94 = arith.mulf %92, %93 : vector<1x128xf32>
    %cst_46 = arith.constant 9.99999974E-6 : f32
    %95 = vector.broadcast %cst_46 : f32 to vector<1x128xf32>
    %96 = arith.addf %94, %95 : vector<1x128xf32>
    %97 = math.rsqrt %96 : vector<1x128xf32>
    %98 = arith.mulf %82, %97 : vector<1x128xf32>
    %99 = arith.mulf %87, %98 : vector<1x128xf32>
    %100 = arith.subf %83, %99 : vector<1x128xf32>
    %101 = vector.broadcast %79 : vector<1x128xf32> to vector<32x128xf32>
    %102 = arith.mulf %62, %101 : vector<32x128xf32>
    %103 = vector.broadcast %98 : vector<1x128xf32> to vector<32x128xf32>
    %104 = arith.mulf %17, %103 : vector<32x128xf32>
    %105 = arith.addf %102, %104 : vector<32x128xf32>
    %106 = arith.addf %81, %100 : vector<1x128xf32>
    %107 = vector.broadcast %106 : vector<1x128xf32> to vector<32x128xf32>
    %108 = arith.addf %105, %107 : vector<32x128xf32>
    %cst_47 = arith.constant 0.000000e+00 : f32
    %109 = vector.broadcast %cst_47 : f32 to vector<32x128xf32>
    %110 = arith.maximumf %108, %109 : vector<32x128xf32>
    %c0_48 = arith.constant 0 : index
    %c0_49 = arith.constant 0 : index
    %111 = vector.load %arg11[%c0_48, %c0_49] : memref<32x128xf32, #tpu.memory_space<vmem>>, vector<32x128xf32>
    tpu.vector_store %arg11[%c0_48, %c0_49], %110 {strides = array<i32>} : memref<32x128xf32, #tpu.memory_space<vmem>>, vector<32x128xf32>,
    return
  }
}

</mosaic_0001>

<bundles_post_ra>
// kernel: tpu_custom_call.1
= control target key start
LH: loop header
LB: loop body
LE: loop exit
PB: predicated region body
PF: predicated region fallthrough
CT: control target
= control target key end

     0   :  { %16 = vsyncpa [#allocation3], 0  ;;  %s1499_s0 = inlined_call_operand.vmem [shape: f32[32,128], index: 0, kind: input, shape index: {}]   ;;  %s1500_s1 = inlined_call_operand.hbm [shape: bf16[128,256], index: 1, kind: input, shape index: {}]   ;;  %s1501_s2 = inlined_call_operand.hbm [shape: bf16[3,128,128], index: 2, kind: input, shape index: {}]   ;;  %s1502_s3 = inlined_call_operand.vmem [shape: f32[32,1], index: 3, kind: input, shape index: {}]   ;;  %s1503_s4 = inlined_call_operand.vmem [shape: f32[32,1], index: 4, kind: input, shape index: {}]   ;;  %s1504_s5 = inlined_call_operand.vmem [shape: f32[1,128], index: 5, kind: input, shape index: {}]   ;;  %s1505_s6 = inlined_call_operand.vmem [shape: f32[1,128], index: 6, kind: input, shape index: {}]   ;;  %s1506_s7 = inlined_call_operand.vmem [shape: f32[1,128], index: 7, kind: input, shape index: {}]   ;;  %s1507_s8 = inlined_call_operand.vmem [shape: f32[1,128], index: 8, kind: input, shape index: {}]   ;;  %s1508_s9 = inlined_call_operand.vmem [shape: f32[1,128], index: 9, kind: input, shape index: {}]   ;;  %s1509_s10 = inlined_call_operand.vmem [shape: f32[1,128], index: 10, kind: input, shape index: {}]   ;;  %s1510_s11 = inlined_call_operand.hbm [shape: f32[32,128], index: 11, kind: output, shape index: {}]  }
   0x1   :  { %17 = vsyncpa [#allocation6], 0 }
   0x2   :  { %18 = vsyncpa [#allocation4], 0  ;;  %s1162_s17 = smov [#allocation2]   ;;  %s1090_s21 = scalar_lea.hbm %s1500_s1, 2048 }
   0x3   :  { %s26_s18 = sshll.u32 %s1162_s17, 4  ;;  %p1091_p0 = scmp.ne.s32.totalorder %s1500_s1, %s1090_s21  ;;  %s27_s18 = int_to_ptr.vmem [resolvable:$true] %s26_s18 }
   0x4   :  { %p1094_p1 = scmp.lt.u32.totalorder %s1090_s21, %s1500_s1 }
   0x6   :  { %p1096_p2 = pnand %p1094_p1, %p1091_p0 }
   0x8   :  { %1099 = shalt.err (!%p1096_p2)
}
   0x9   :  { %s1100_s26 = scalar_lea.vmem %s27_s18, 2048  ;;  %p1105_p4 = scmp.lt.s32.totalorder %s27_s18, %s27_s18 }
   0xa   :  { %p1101_p3 = scmp.ne.s32.totalorder %s27_s18, %s1100_s26  ;;  %p1106_p5 = scmp.lt.s32.totalorder %s1100_s26, %s1100_s26 }
   0xc   :  { %p1107_p6 = por %p1106_p5, %p1105_p4 }
   0xe   :  { %p1108_p7 = pnand %p1107_p6, %p1101_p3 }
  0x10   :  { %1111 = shalt.err (!%p1108_p7)
}
  0x11   :  { %s1163_s27 = smov 128   ;;  %s1164_s28 = smov 8  }
  0x12   :  { %32 = dma.hbm_to_vmem [thread:$0]  %s1500_s1, 2048, %s27_s18, [#allocation3], %s1163_s27, %s1163_s27, %s1164_s28  }
  0x13   :  { %s1165_s12 = smov [#allocation5]   ;;  %s1112_s16 = scalar_lea.hbm %s1501_s2, 3072 }
  0x14   :  { %s38_s13 = sshll.u32 %s1165_s12, 4  ;;  %p1113_p8 = scmp.ne.s32.totalorder %s1501_s2, %s1112_s16  ;;  %s39_s13 = int_to_ptr.vmem [resolvable:$true] %s38_s13 }
  0x15   :  { %p1116_p9 = scmp.lt.u32.totalorder %s1112_s16, %s1501_s2 }
  0x17   :  { %p1118_p10 = pnand %p1116_p9, %p1113_p8 }
  0x19   :  { %1121 = shalt.err (!%p1118_p10)
}
  0x1a   :  { %s1122_s22 = scalar_lea.vmem %s39_s13, 3072  ;;  %p1127_p12 = scmp.lt.s32.totalorder %s39_s13, %s39_s13 }
  0x1b   :  { %p1123_p11 = scmp.ne.s32.totalorder %s39_s13, %s1122_s22  ;;  %p1128_p13 = scmp.lt.s32.totalorder %s1122_s22, %s1122_s22 }
  0x1d   :  { %p1129_p0 = por %p1128_p13, %p1127_p12 }
  0x1f   :  { %p1130_p1 = pnand %p1129_p0, %p1123_p11 }
  0x21   :  { %1133 = shalt.err (!%p1130_p1)
}
  0x22   :  { %s1166_s1 = smov 64   ;;  %s1167_s18 = smov 4  }
  0x23   :  { %44 = dma.hbm_to_vmem [thread:$0]  %s1501_s2, 3072, %s39_s13, [#allocation6], %s1166_s1, %s1166_s1, %s1167_s18  }
  0x24   :  { %1156 = dma.done.wait [#allocation3], 2048  }
  0x25   :  { %1157 = vsyncadd [#allocation3], 4294965248 }
  0x26   :  { %1158 = dma.done.wait [#allocation6], 3072  }
  0x27   :  { %1159 = vsyncadd [#allocation6], 4294964224  ;;  %v1168_v0 = vmov 0   ;;  %v84_v1 = vlaneseq  ;;  %v78_v3 = vld [vmem:[%s1503_s4 + $0x10] sm:$0xff]  ;;  %v76_v4 = vld [vmem:[%s1503_s4] sm:$0xff] }
  0x28   :  { %1035 = vset.pattern.permute.xlu1 %v1168_v0  ;;  %1034 = vset.pattern.permute.xlu0 %v1168_v0  ;;  %v79_v5 = vld [vmem:[%s1503_s4 + $0x18] sm:$0xff]  ;;  %v77_v6 = vld [vmem:[%s1503_s4 + $0x8] sm:$0xff]  ;;  %v1284_v9 = vld [vmem:[%s1499_s0] sm:$0xff] }
  0x29   :  { %302 = vmatprep.mubr.bf16.mxu0 %v1168_v0  ;;  %v1261_v2 = vshrl.u32 %v84_v1, 7  ;;  %136 = vperm.xlu1 %1035, %v78_v3   ;;  %v1278_v7 = vld [vmem:[%s1499_s0 + $0x8] sm:$0xff]  ;;  %v80_v12 = vrot.slane %v1284_v9, 7  ;;  %v115_v13 = vrot.slane %v1284_v9, 1  ;;  %v72_v14 = vld [vmem:[%s1502_s3] sm:$0xff]  ;;  %v75_v16 = vld [vmem:[%s1502_s3 + $0x18] sm:$0xff] }
  0x2a   :  { %126 = vperm.xlu0 %1034, %v76_v4   ;;  %v116_v8 = vrot.slane %v1278_v7, 1  ;;  %v73_v10 = vld [vmem:[%s1502_s3 + $0x8] sm:$0xff]  ;;  %v81_v11 = vrot.slane %v1278_v7, 7  ;;  %v74_v18 = vld [vmem:[%s1502_s3 + $0x10] sm:$0xff]  ;;  %v71_v36 = vld [vmem:[%s1499_s0 + $0x18] sm:$0xff] }
  0x2b   :  { %vm119_vm0 = vcmp.lt.s32.totalorder %v1261_v2, 7  ;;  %vm86_vm1 = vcmp.lt.s32.totalorder %v1261_v2, 1  ;;  %v1036_v19 = vld [vmem:[#allocation2 + $0x4] ss:$8 sps:$4 sm:$0xff]   ;;  %v1038_v20 = vld [vmem:[#allocation2] ss:$8 sps:$4 sm:$0xff]  }
  0x2c   :  { %v122_v15 = vsel %vm119_vm0, %v115_v13, %v116_v8  ;;  %v1310_v17 = vsel %vm86_vm1, %v80_v12, %v81_v11  ;;  %v1039_v21 = vld [vmem:[#allocation2 + $0x14] ss:$8 sps:$4 sm:$0xff]   ;;  %270 = vmatprep.subr.bf16.mxu0 %v1036_v19  ;;  %v1041_v22 = vld [vmem:[#allocation2 + $0x10] ss:$8 sps:$4 sm:$0xff]   ;;  %v1042_v23 = vld [vmem:[#allocation2 + $0x24] ss:$8 sps:$4 sm:$0xff]  }
  0x2d   :  { %141 = vperm.xlu1 %1035, %v79_v5   ;;  %271 = vmatpush1.bf16.msra.mxu0 %v1038_v20  ;;  %v1044_v24 = vld [vmem:[#allocation2 + $0x20] ss:$8 sps:$4 sm:$0xff]   ;;  %v1045_v25 = vld [vmem:[#allocation2 + $0x34] ss:$8 sps:$4 sm:$0xff]   ;;  %v1047_v26 = vld [vmem:[#allocation2 + $0x30] ss:$8 sps:$4 sm:$0xff]  }
  0x2e   :  { %131 = vperm.xlu0 %1034, %v77_v6   ;;  %272 = vmatprep.subr.bf16.mxu0 %v1039_v21  ;;  %v1048_v27 = vld [vmem:[#allocation2 + $0x44] ss:$8 sps:$4 sm:$0xff]   ;;  %v1050_v28 = vld [vmem:[#allocation2 + $0x40] ss:$8 sps:$4 sm:$0xff]   ;;  %v1051_v29 = vld [vmem:[#allocation2 + $0x54] ss:$8 sps:$4 sm:$0xff]  }
  0x2f   :  { %v1053_v30 = vld [vmem:[#allocation2 + $0x50] ss:$8 sps:$4 sm:$0xff]   ;;  %v1054_v31 = vld [vmem:[#allocation2 + $0x64] ss:$8 sps:$4 sm:$0xff]   ;;  %v1056_v32 = vld [vmem:[#allocation2 + $0x60] ss:$8 sps:$4 sm:$0xff]  }
  0x30   :  { %v1057_v33 = vld [vmem:[#allocation2 + $0x74] ss:$8 sps:$4 sm:$0xff]   ;;  %v1059_v34 = vld [vmem:[#allocation2 + $0x70] ss:$8 sps:$4 sm:$0xff]   ;;  %v118_v39 = vrot.slane %v71_v36, 1  ;;  %v83_v53 = vrot.slane %v71_v36, 7 }
  0x31   :  { %98 = vperm.xlu1 %1035, %v73_v10   ;;  %273 = vmatpush1.bf16.msra.mxu0 %v1041_v22  ;;  %v70_v35 = vld [vmem:[%s1499_s0 + $0x10] sm:$0xff]  ;;  %v1062_v21 = vld [vmem:[#allocation5] sm:$0xff]  }
  0x32   :  { %93 = vperm.xlu0 %1034, %v72_v14   ;;  %274 = vmatprep.subr.bf16.mxu0 %v1042_v23  ;;  %v117_v37 = vrot.slane %v70_v35, 1  ;;  %v123_v47 = vsel %vm119_vm0, %v118_v39, %v115_v13  ;;  %v90_v56 = vsel %vm86_vm1, %v83_v53, %v80_v12  ;;  %v82_v61 = vrot.slane %v70_v35, 7  ;;  %v1063_v22 = vld [vmem:[#allocation5 + $0x50] sm:$0xff]   ;;  %v1064_v23 = vld [vmem:[#allocation5 + $0x8] sm:$0xff]  }
  0x33   :  { %978 = vmatprep.subr.bf16.mxu1 %v1062_v21 }
  0x34   :  { %v121_v41 = vsel %vm119_vm0, %v116_v8, %v117_v37  ;;  %v120_v43 = vsel %vm119_vm0, %v117_v37, %v118_v39  ;;  %v87_v6 = vsel %vm86_vm1, %v82_v61, %v83_v53  ;;  %v88_v8 = vsel %vm86_vm1, %v81_v11, %v82_v61  ;;  %v1061_v11 = vld [vmem:[#allocation5 + $0x48] sm:$0xff]   ;;  %979 = vmatpush3.bf16.msra.mxu1 %v1062_v21 }
  0x35   :  { %108 = vperm.xlu1 %1035, %v75_v16   ;;  %275 = vmatpush1.bf16.msra.mxu0 %v1044_v24  ;;  %v1066_v24 = vld [vmem:[#allocation5 + $0x10] sm:$0xff]  }
  0x36   :  { %103 = vperm.xlu0 %1034, %v74_v18   ;;  %276 = vmatprep.subr.bf16.mxu0 %v1045_v25  ;;  %v1067_v25 = vld [vmem:[#allocation5 + $0x60] sm:$0xff]  }
  0x37   :  { %980 = vmatprep.subr.bf16.mxu1 %v1064_v23 }
  0x38   :  { %981 = vmatpush3.bf16.msra.mxu1 %v1064_v23 }
  0x39   :  { %150 = vrot.lane.b32.xlu1 %v1278_v7, %s1167_s18  ;;  %277 = vmatpush1.bf16.msra.mxu0 %v1047_v26  ;;  %v1060_v7 = vld [vmem:[#allocation5 + $0x40] sm:$0xff]   ;;  %v1068_v26 = vld [vmem:[#allocation5 + $0x18] sm:$0xff]  }
  0x3a   :  { %148 = vrot.lane.b32.xlu0 %v1284_v9, %s1167_s18  ;;  %278 = vmatprep.subr.bf16.mxu0 %v1048_v27  ;;  %v1069_v27 = vld [vmem:[#allocation5 + $0x68] sm:$0xff]  }
  0x3b   :  { %982 = vmatprep.subr.bf16.mxu1 %v1066_v24 }
  0x3c   :  { %983 = vmatpush3.bf16.msra.mxu1 %v1066_v24 }
  0x3d   :  { %279 = vmatpush1.bf16.msra.mxu0 %v1050_v28  ;;  %984 = vmatprep.subr.bf16.mxu1 %v1068_v26  ;;  %v1070_v28 = vld [vmem:[#allocation5 + $0x20] sm:$0xff]  }
  0x3e   :  { %280 = vmatprep.subr.bf16.mxu0 %v1051_v29  ;;  %v1071_v29 = vld [vmem:[#allocation5 + $0x70] sm:$0xff]  }
  0x40   :  { %985 = vmatpush3.bf16.msra.mxu1 %v1068_v26 }
  0x41   :  { %281 = vmatpush1.bf16.msra.mxu0 %v1053_v30  ;;  %986 = vmatprep.subr.bf16.mxu1 %v1070_v28  ;;  %v1072_v30 = vld [vmem:[#allocation5 + $0x28] sm:$0xff]  }
  0x42   :  { %282 = vmatprep.subr.bf16.mxu0 %v1054_v31  ;;  %v1073_v31 = vld [vmem:[#allocation5 + $0x78] sm:$0xff]  }
  0x44   :  { %987 = vmatpush3.bf16.msra.mxu1 %v1070_v28 }
  0x45   :  { %283 = vmatpush1.bf16.msra.mxu0 %v1056_v32  ;;  %988 = vmatprep.subr.bf16.mxu1 %v1072_v30  ;;  %v1074_v32 = vld [vmem:[#allocation5 + $0x30] sm:$0xff]  }
  0x46   :  { %284 = vmatprep.subr.bf16.mxu0 %v1057_v33  ;;  %v1075_v33 = vld [vmem:[#allocation5 + $0x38] sm:$0xff]  }
  0x48   :  { %989 = vmatpush3.bf16.msra.mxu1 %v1072_v30 }
  0x49   :  { %285 = vmatpush1.bf16.msra.mxu0 %v1059_v34  ;;  %990 = vmatprep.subr.bf16.mxu1 %v1074_v32  ;;  %v1375_v34 = vld [vmem:[#allocation5 + $0x80] sm:$0xff]  }
  0x4a   :  { %958 = vmatprep.subr.bf16.mxu0 %v1060_v7 }
  0x4c   :  { %991 = vmatpush3.bf16.msra.mxu1 %v1074_v32 }
  0x4d   :  { %992 = vmatprep.subr.bf16.mxu1 %v1075_v33 }
  0x50   :  { %993 = vmatpush3.bf16.msra.mxu1 %v1075_v33 }
  0x51   :  { %998 = vmatprep.subr.bf16.mxu1 %v1375_v34 }
  0xa8   :  { %v1336_v45 = vpop.permute.xlu1 %136 }
  0xa9   :  { %v1325_v38 = vpop.permute.xlu0 %126  ;;  %v146_v46 = vmul.f32 %v1336_v45, %v120_v43 }
  0xaa   :  { %v144_v40 = vmul.f32 %v1325_v38, %v122_v15 }
  0xac   :  { %160 = vrot.lane.b32.xlu0 %v144_v40, %s1164_s28  ;;  %v1347_v48 = vpop.permute.xlu1 %141 }
  0xad   :  { %v1331_v42 = vpop.permute.xlu0 %131  ;;  %v147_v49 = vmul.f32 %v1347_v48, %v123_v47 }
  0xae   :  { %v145_v44 = vmul.f32 %v1331_v42, %v121_v41 }
  0xb0   :  { %162 = vrot.lane.b32.xlu1 %v145_v44, %s1164_s28  ;;  %152 = vrot.lane.b32.xlu0 %v70_v35, %s1167_s18  ;;  %v1353_v51 = vpop.permute.xlu1 %98 }
  0xb1   :  { %v1351_v50 = vpop.permute.xlu0 %93  ;;  %v112_v59 = vmul.f32 %v1353_v51, %v1310_v17 }
  0xb2   :  { %v111_v60 = vmul.f32 %v1351_v50, %v90_v56 }
  0xb4   :  { %154 = vrot.lane.b32.xlu1 %v71_v36, %s1167_s18  ;;  %164 = vrot.lane.b32.xlu0 %v146_v46, %s1164_s28  ;;  %v1357_v54 = vpop.permute.xlu1 %108 }
  0xb5   :  { %v1355_v52 = vpop.permute.xlu0 %103  ;;  %v114_v12 = vmul.f32 %v1357_v54, %v87_v6 }
  0xb6   :  { %v113_v13 = vmul.f32 %v1355_v52, %v88_v8 }
  0xb8   :  { %166 = vrot.lane.b32.xlu1 %v147_v49, %s1164_s28  ;;  %v151_v57 = vpop.permute.xlu1 %150 }
  0xb9   :  { %v149_v55 = vpop.permute.xlu0 %148  ;;  %v157_v62 = vadd.f32 %v151_v57, %v112_v59 }
  0xba   :  { %v156_v63 = vadd.f32 %v149_v55, %v111_v60 }
 0x11e   :  { %v161_v58 = vpop.permute.xlu0 %160 }
 0x11f   :  { %v168_v4 = vadd.f32 %v161_v58, %v156_v63 }
 0x122   :  { %v163_v1 = vpop.permute.xlu1 %162  ;;  %v153_v3 = vpop.permute.xlu0 %152 }
 0x123   :  { %v169_v5 = vadd.f32 %v163_v1, %v157_v62  ;;  %v158_v15 = vadd.f32 %v153_v3, %v113_v13 }
 0x125   :  { %v172_v9 = vpack.c.bf16 %v169_v5, %v168_v4 }
 0x126   :  { %v155_v10 = vpop.permute.xlu1 %154  ;;  %v165_v14 = vpop.permute.xlu0 %164 }
 0x127   :  { %303 = vmatmul.mubr.bf16.vlgmr.msra.gmra.mrb[0].mxu0 %v172_v9  ;;  %v159_v16 = vadd.f32 %v155_v10, %v114_v12  ;;  %v170_v18 = vadd.f32 %v165_v14, %v158_v15 }
 0x128   :  { %312 = vmatprep.mubr.bf16.mxu0 %v1168_v0  ;;  %959 = vmatpush3.bf16.msra.mxu0 %v1060_v7  ;;  %v1065_v0 = vld [vmem:[#allocation5 + $0x58] sm:$0xff]  }
 0x129   :  { %960 = vmatprep.subr.bf16.mxu0 %v1061_v11 }
 0x12a   :  { %v167_v17 = vpop.permute.xlu1 %166 }
 0x12b   :  { %v171_v19 = vadd.f32 %v167_v17, %v159_v16 }
 0x12c   :  { %961 = vmatpush3.bf16.msra.mxu0 %v1061_v11 }
 0x12d   :  { %v173_v20 = vpack.c.bf16 %v171_v19, %v170_v18  ;;  %962 = vmatprep.subr.bf16.mxu0 %v1063_v22 }
 0x12f   :  { %313 = vmatmul.mubr.bf16.gmra.mrb[4].mxu0 %v173_v20 }
 0x130   :  { %963 = vmatpush3.bf16.msra.mxu0 %v1063_v22 }
 0x131   :  { %964 = vmatprep.subr.bf16.mxu0 %v1065_v0 }
 0x134   :  { %965 = vmatpush3.bf16.msra.mxu0 %v1065_v0 }
 0x135   :  { %966 = vmatprep.subr.bf16.mxu0 %v1067_v25 }
 0x138   :  { %967 = vmatpush3.bf16.msra.mxu0 %v1067_v25 }
 0x139   :  { %968 = vmatprep.subr.bf16.mxu0 %v1069_v27 }
 0x13c   :  { %969 = vmatpush3.bf16.msra.mxu0 %v1069_v27 }
 0x13d   :  { %970 = vmatprep.subr.bf16.mxu0 %v1071_v29 }
 0x140   :  { %971 = vmatpush3.bf16.msra.mxu0 %v1071_v29 }
 0x141   :  { %972 = vmatprep.subr.bf16.mxu0 %v1073_v31 }
 0x144   :  { %973 = vmatpush3.bf16.msra.mxu0 %v1073_v31 }
 0x1fa   :  { %v1378_v35 = vpop.f32.mrb[0].mxu0 }
 0x1fb   :  { %v1380_v36 = vpop.f32.mrb[1].mxu0 }
 0x1fc   :  { %v1382_v37 = vpop.f32.mrb[2].mxu0 }
 0x1fd   :  { %v325_v39 = vadd.f32 %v1382_v37, %v1378_v35  ;;  %v1386_v40 = vpop.f32.mrb[3].mxu0 }
 0x1fe   :  { %v794_v41 = vadd.f32 %v1386_v40, %v1380_v36 }
 0x202   :  { %v1390_v43 = vpop.f32.mrb[4].mxu0 }
 0x203   :  { %v326_v44 = vadd.f32 %v325_v39, %v1390_v43  ;;  %v1393_v46 = vpop.f32.mrb[5].mxu0 }
 0x204   :  { %v795_v47 = vadd.f32 %v794_v41, %v1393_v46  ;;  %v1396_v49 = vpop.f32.mrb[6].mxu0 }
 0x205   :  { %v327_v53 = vadd.f32 %v326_v44, %v1396_v49  ;;  %v1399_v55 = vpop.f32.mrb[7].mxu0 }
 0x206   :  { %v796_v56 = vadd.f32 %v795_v47, %v1399_v55 }
 0x207   :  { %v328_v57 = vrot.slane %v327_v53, 4 }
 0x208   :  { %v797_v58 = vrot.slane %v796_v56, 4 }
 0x209   :  { %v329_v59 = vadd.f32 %v328_v57, %v327_v53 }
 0x20a   :  { %v798_v60 = vadd.f32 %v797_v58, %v796_v56 }
 0x20b   :  { %v330_v61 = vrot.slane %v329_v59, 2 }
 0x20c   :  { %v799_v62 = vrot.slane %v798_v60, 2 }
 0x20d   :  { %v331_v63 = vadd.f32 %v330_v61, %v329_v59 }
 0x20e   :  { %v800_v1 = vadd.f32 %v799_v62, %v798_v60 }
 0x20f   :  { %v332_v3 = vrot.slane %v331_v63, 1 }
 0x210   :  { %v801_v4 = vrot.slane %v800_v1, 1 }
 0x211   :  { %v333_v5 = vadd.f32 %v332_v3, %v331_v63  ;;  %v323_v63 = vld [vmem:[%s1504_s5] sm:$0x1] }
 0x212   :  { %v802_v6 = vadd.f32 %v801_v4, %v800_v1  ;;  %v1414_v1 = vsub.s32 0, %v1261_v2  ;;  %v792_v3 = vld [vmem:[%s1508_s9] sm:$0x1]  ;;  %v1078_v2 = vld [vmem:[#allocation5 + $0x90] sm:$0xff]  }
 0x213   :  { %v334_v8 = vmul.f32 0.03125, %v333_v5 }
 0x214   :  { %v803_v9 = vmul.f32 0.03125, %v802_v6 }
 0x215   :  { %v335_v10 = vsub.f32 %v1378_v35, %v334_v8  ;;  %v336_v12 = vsub.f32 %v1382_v37, %v334_v8  ;;  %v337_v13 = vsub.f32 %v1390_v43, %v334_v8  ;;  %v338_v14 = vsub.f32 %v1396_v49, %v334_v8 }
 0x216   :  { %v804_v15 = vsub.f32 %v1380_v36, %v803_v9  ;;  %v805_v16 = vsub.f32 %v1386_v40, %v803_v9  ;;  %v806_v17 = vsub.f32 %v1393_v46, %v803_v9  ;;  %v807_v18 = vsub.f32 %v1399_v55, %v803_v9 }
 0x217   :  { %v339_v19 = vmul.f32 %v335_v10, %v335_v10  ;;  %v340_v20 = vmul.f32 %v336_v12, %v336_v12  ;;  %v341_v21 = vmul.f32 %v337_v13, %v337_v13  ;;  %v342_v24 = vmul.f32 %v338_v14, %v338_v14  ;;  %v324_v10 = vld [vmem:[%s1505_s6] sm:$0x1] }
 0x218   :  { %v808_v7 = vmul.f32 %v804_v15, %v804_v15  ;;  %v809_v11 = vmul.f32 %v805_v16, %v805_v16  ;;  %v810_v23 = vmul.f32 %v806_v17, %v806_v17  ;;  %v811_v26 = vmul.f32 %v807_v18, %v807_v18 }
 0x219   :  { %v343_v22 = vadd.f32 %v340_v20, %v339_v19 }
 0x21a   :  { %v812_v0 = vadd.f32 %v809_v11, %v808_v7 }
 0x21b   :  { %v344_v25 = vadd.f32 %v343_v22, %v341_v21 }
 0x21c   :  { %v813_v27 = vadd.f32 %v812_v0, %v810_v23 }
 0x21d   :  { %v345_v28 = vadd.f32 %v344_v25, %v342_v24 }
 0x21e   :  { %v814_v29 = vadd.f32 %v813_v27, %v811_v26 }
 0x21f   :  { %v346_v30 = vrot.slane %v345_v28, 4 }
 0x220   :  { %v815_v31 = vrot.slane %v814_v29, 4 }
 0x221   :  { %v347_v32 = vadd.f32 %v346_v30, %v345_v28 }
 0x222   :  { %v816_v33 = vadd.f32 %v815_v31, %v814_v29 }
 0x223   :  { %v348_v39 = vrot.slane %v347_v32, 2 }
 0x224   :  { %v817_v41 = vrot.slane %v816_v33, 2 }
 0x225   :  { %v349_v44 = vadd.f32 %v348_v39, %v347_v32 }
 0x226   :  { %v818_v47 = vadd.f32 %v817_v41, %v816_v33 }
 0x227   :  { %v350_v53 = vrot.slane %v349_v44, 1 }
 0x228   :  { %v819_v56 = vrot.slane %v818_v47, 1 }
 0x229   :  { %v351_v57 = vadd.f32 %v350_v53, %v349_v44 }
 0x22a   :  { %v820_v58 = vadd.f32 %v819_v56, %v818_v47 }
 0x22b   :  { %v352_v59 = vmul.f32 0.03125, %v351_v57 }
 0x22c   :  { %v821_v60 = vmul.f32 0.03125, %v820_v58 }
 0x22d   :  { %v353_v61 = vadd.f32 1e-05, %v352_v59 }
 0x22e   :  { %v822_v62 = vadd.f32 1e-05, %v821_v60 }
 0x22f   :  { %1084 = vrsqrt.f32 %v353_v61 }
 0x230   :  { %1086 = vrsqrt.f32 %v822_v62  ;;  %v1077_v62 = vld [vmem:[#allocation5 + $0x88] sm:$0xff]  }
 0x239   :  { %v1085_v4 = vpop.eup %1084 }
 0x23a   :  { %v1087_v5 = vpop.eup %1086  ;;  %v355_v6 = vmul.f32 %v1085_v4, %v323_v63 }
 0x23b   :  { %v824_v12 = vmul.f32 %v1087_v5, %v792_v3  ;;  %v1079_v5 = vld [vmem:[#allocation5 + $0x98] sm:$0xff]  }
 0x23c   :  { %v356_v13 = vmul.f32 %v355_v6, %v334_v8  ;;  %v362_v14 = vrot.slane %v355_v6, %v1414_v1 }
 0x23d   :  { %v1423_v15 = vmul.f32 %v824_v12, %v803_v9  ;;  %v841_v16 = vrot.slane %v824_v12, %v1414_v1 }
 0x23e   :  { %v357_v17 = vsub.f32 %v324_v10, %v356_v13  ;;  %v366_v18 = vmul.f32 %v362_v14, %v1390_v43  ;;  %v367_v19 = vmul.f32 %v362_v14, %v1396_v49  ;;  %v364_v20 = vmul.f32 %v362_v14, %v1378_v35 }
 0x23f   :  { %v1430_v7 = vmul.f32 %v841_v16, %v1399_v55  ;;  %v365_v11 = vmul.f32 %v362_v14, %v1382_v37  ;;  %v1434_v8 = vmul.f32 %v841_v16, %v1386_v40  ;;  %v1438_v21 = vmul.f32 %v841_v16, %v1380_v36 }
 0x240   :  { %v372_v9 = vrot.slane %v357_v17, %v1414_v1  ;;  %v1441_v22 = vmul.f32 %v841_v16, %v1393_v46 }
 0x242   :  { %v376_v43 = vadd.f32 %v372_v9, %v366_v18  ;;  %v377_v49 = vadd.f32 %v372_v9, %v367_v19  ;;  %v374_v23 = vadd.f32 %v372_v9, %v364_v20  ;;  %v375_v35 = vadd.f32 %v372_v9, %v365_v11 }
 0x244   :  { %v380_v0 = vmax.f32 %v376_v43, 0.0  ;;  %v381_v55 = vmax.f32 %v377_v49, 0.0  ;;  %v378_v24 = vmax.f32 %v374_v23, 0.0  ;;  %v379_v25 = vmax.f32 %v375_v35, 0.0 }
 0x246   :  { %v399_v37 = vrot.slane %v381_v55, 1  ;;  %v427_v26 = vpack.c.bf16 %v381_v55, %v380_v0  ;;  %v426_v40 = vpack.c.bf16 %v379_v25, %v378_v24  ;;  %v382_v27 = vrot.slane %v378_v24, 7 }
 0x247   :  { %v383_v28 = vrot.slane %v379_v25, 7  ;;  %v385_v29 = vrot.slane %v381_v55, 7  ;;  %v384_v30 = vrot.slane %v380_v0, 7  ;;  %v396_v36 = vrot.slane %v378_v24, 1 }
 0x248   :  { %974 = vmatprep.mubr.bf16.mxu0 %v426_v40  ;;  %v397_v31 = vrot.slane %v379_v25, 1  ;;  %v398_v46 = vrot.slane %v380_v0, 1 }
 0x249   :  { %975 = vmatmul.mubr.bf16.vlgmr.msra.gmra.mrb[8].mxu0 %v427_v26  ;;  %v388_v32 = vsel %vm86_vm1, %v382_v27, %v383_v28  ;;  %v389_v33 = vsel %vm86_vm1, %v385_v29, %v382_v27  ;;  %v386_v39 = vsel %vm86_vm1, %v384_v30, %v385_v29  ;;  %v387_v41 = vsel %vm86_vm1, %v383_v28, %v384_v30 }
 0x24a   :  { %v390_v44 = vmul.f32 %v389_v33, %v1351_v50  ;;  %v391_v47 = vmul.f32 %v388_v32, %v1353_v51  ;;  %v392_v53 = vmul.f32 %v387_v41, %v1355_v52  ;;  %v393_v56 = vmul.f32 %v386_v39, %v1357_v54 }
 0x24b   :  { %v401_v57 = vsel %vm119_vm0, %v397_v31, %v398_v46  ;;  %v402_v58 = vsel %vm119_vm0, %v396_v36, %v397_v31  ;;  %v400_v59 = vsel %vm119_vm0, %v398_v46, %v399_v37  ;;  %v403_v60 = vsel %vm119_vm0, %v399_v37, %v396_v36 }
 0x24c   :  { %v394_v61 = vpack.c.bf16 %v391_v47, %v390_v44  ;;  %v395_v50 = vpack.c.bf16 %v393_v56, %v392_v53  ;;  %v404_v51 = vmul.f32 %v402_v58, %v1325_v38  ;;  %v405_v52 = vmul.f32 %v401_v57, %v1331_v42  ;;  %v1080_v38 = vld [vmem:[#allocation5 + $0xa0] sm:$0xff]   ;;  %v1081_v42 = vld [vmem:[#allocation5 + $0xa8] sm:$0xff]  }
 0x24d   :  { %v406_v54 = vmul.f32 %v400_v59, %v1336_v45  ;;  %v407_v63 = vmul.f32 %v403_v60, %v1347_v48  ;;  %v1082_v45 = vld [vmem:[#allocation5 + $0xb0] sm:$0xff]   ;;  %v1083_v48 = vld [vmem:[#allocation5 + $0xb8] sm:$0xff]   ;;  %v757_v59 = vld [vmem:[%s1506_s7] sm:$0x1]  ;;  %s1169_s7 = smov [#allocation7]  }
 0x24e   :  { %994 = vmatprep.mubr.bf16.mxu1 %v394_v61  ;;  %v408_v3 = vpack.c.bf16 %v405_v52, %v404_v51  ;;  %v793_v61 = vld [vmem:[%s1509_s10] sm:$0x1] }
 0x24f   :  { %995 = vmatmul.mubr.bf16.vlgmr.msra.gmra.mrb[0].mxu1 %v395_v50  ;;  %v409_v4 = vpack.c.bf16 %v407_v63, %v406_v54  ;;  %v758_v51 = vld [vmem:[%s1507_s8] sm:$0x1]  ;;  %v826_v54 = vsub.f32 %v793_v61, %v1423_v15  ;;  %s875_s8 = sshll.u32 %s1169_s7, 4  ;;  %s876_s8 = int_to_ptr.vmem [resolvable:$true] %s875_s8 }
 0x250   :  { %999 = vmatpush3.bf16.msra.mxu1 %v1375_v34  ;;  %1014 = vmatprep.mubr.bf16.mxu1 %v408_v3  ;;  %s1134_s10 = scalar_lea.vmem %s876_s8, 512  ;;  %p1139_p3 = scmp.lt.s32.totalorder %s876_s8, %s876_s8 }
 0x251   :  { %1000 = vmatprep.subr.bf16.mxu1 %v1077_v62  ;;  %p1135_p2 = scmp.ne.s32.totalorder %s876_s8, %s1134_s10  ;;  %p1140_p4 = scmp.lt.s32.totalorder %s1134_s10, %s1134_s10 }
 0x253   :  { %p1141_p5 = por %p1140_p4, %p1139_p3 }
 0x254   :  { %1001 = vmatpush3.bf16.msra.mxu1 %v1077_v62 }
 0x255   :  { %1002 = vmatprep.subr.bf16.mxu1 %v1078_v2  ;;  %p1142_p6 = pnand %p1141_p5, %p1135_p2 }
 0x258   :  { %1003 = vmatpush3.bf16.msra.mxu1 %v1078_v2 }
 0x259   :  { %1004 = vmatprep.subr.bf16.mxu1 %v1079_v5 }
 0x25c   :  { %1005 = vmatpush3.bf16.msra.mxu1 %v1079_v5 }
 0x25d   :  { %1006 = vmatprep.subr.bf16.mxu1 %v1080_v38 }
 0x260   :  { %1007 = vmatpush3.bf16.msra.mxu1 %v1080_v38 }
 0x261   :  { %1008 = vmatprep.subr.bf16.mxu1 %v1081_v42 }
 0x264   :  { %1009 = vmatpush3.bf16.msra.mxu1 %v1081_v42 }
 0x265   :  { %1010 = vmatprep.subr.bf16.mxu1 %v1082_v45 }
 0x268   :  { %1011 = vmatpush3.bf16.msra.mxu1 %v1082_v45 }
 0x269   :  { %1012 = vmatprep.subr.bf16.mxu1 %v1083_v48 }
 0x26c   :  { %1013 = vmatpush3.bf16.msra.mxu1 %v1083_v48 }
 0x26f   :  { %1015 = vmatmul.mubr.bf16.vlgmr.msra.gmra.mrb[0].mxu1 %v409_v4 }
 0x31c   :  { %v976_v34 = vpop.f32.mrb[8].mxu0 }
 0x31d   :  { %v527_v6 = vpop.f32.mrb[9].mxu0 }
 0x31e   :  { %v977_v10 = vpop.f32.mrb[10].mxu0 }
 0x31f   :  { %v530_v12 = vpop.f32.mrb[11].mxu0 }
 0x342   :  { %v1016_v13 = vpop.f32.mrb[0].mxu1 }
 0x343   :  { %v1018_v14 = vadd.f32 %v1016_v13, %v976_v34  ;;  %v738_v16 = vpop.f32.mrb[1].mxu1 }
 0x344   :  { %v1019_v17 = vadd.f32 %v738_v16, %v527_v6  ;;  %v1017_v18 = vpop.f32.mrb[2].mxu1 }
 0x345   :  { %v1020_v19 = vadd.f32 %v1017_v18, %v977_v10  ;;  %v741_v20 = vpop.f32.mrb[3].mxu1 }
 0x346   :  { %v1021_v11 = vadd.f32 %v741_v20, %v530_v12 }
 0x348   :  { %v759_v9 = vadd.f32 %v1021_v11, %v1019_v17 }
 0x34a   :  { %v760_v43 = vadd.f32 %v1018_v14, %v759_v9 }
 0x34c   :  { %v761_v49 = vadd.f32 %v1020_v19, %v760_v43 }
 0x34e   :  { %v762_v23 = vrot.slane %v761_v49, 4 }
 0x350   :  { %v763_v35 = vadd.f32 %v762_v23, %v761_v49 }
 0x352   :  { %v764_v0 = vrot.slane %v763_v35, 2 }
 0x354   :  { %v765_v55 = vadd.f32 %v764_v0, %v763_v35 }
 0x356   :  { %v766_v24 = vrot.slane %v765_v55, 1 }
 0x358   :  { %v767_v25 = vadd.f32 %v766_v24, %v765_v55 }
 0x35a   :  { %v768_v37 = vmul.f32 0.03125, %v767_v25 }
 0x35c   :  { %v769_v26 = vsub.f32 %v1019_v17, %v768_v37  ;;  %v770_v40 = vsub.f32 %v1021_v11, %v768_v37  ;;  %v771_v27 = vsub.f32 %v1018_v14, %v768_v37  ;;  %v772_v28 = vsub.f32 %v1020_v19, %v768_v37 }
 0x35e   :  { %v773_v29 = vmul.f32 %v769_v26, %v769_v26  ;;  %v774_v30 = vmul.f32 %v770_v40, %v770_v40  ;;  %v775_v36 = vmul.f32 %v771_v27, %v771_v27  ;;  %v776_v46 = vmul.f32 %v772_v28, %v772_v28 }
 0x360   :  { %v777_v31 = vadd.f32 %v774_v30, %v773_v29 }
 0x362   :  { %v778_v32 = vadd.f32 %v777_v31, %v775_v36 }
 0x364   :  { %v779_v33 = vadd.f32 %v778_v32, %v776_v46 }
 0x366   :  { %v780_v39 = vrot.slane %v779_v33, 4 }
 0x368   :  { %v781_v41 = vadd.f32 %v780_v39, %v779_v33 }
 0x36a   :  { %v782_v44 = vrot.slane %v781_v41, 2 }
 0x36c   :  { %v783_v47 = vadd.f32 %v782_v44, %v781_v41 }
 0x36e   :  { %v784_v53 = vrot.slane %v783_v47, 1 }
 0x370   :  { %v785_v56 = vadd.f32 %v784_v53, %v783_v47 }
 0x372   :  { %v786_v57 = vmul.f32 0.03125, %v785_v56 }
 0x374   :  { %v787_v58 = vadd.f32 1e-05, %v786_v57 }
 0x376   :  { %1088 = vrsqrt.f32 %v787_v58 }
 0x380   :  { %v1089_v60 = vpop.eup %1088 }
 0x381   :  { %v789_v50 = vmul.f32 %v1089_v60, %v757_v59 }
 0x383   :  { %v790_v52 = vmul.f32 %v789_v50, %v768_v37  ;;  %v831_v62 = vrot.slane %v789_v50, %v1414_v1 }
 0x385   :  { %v791_v63 = vsub.f32 %v758_v51, %v790_v52  ;;  %v834_v3 = vmul.f32 %v1021_v11, %v831_v62  ;;  %v833_v4 = vmul.f32 %v1019_v17, %v831_v62  ;;  %v835_v2 = vmul.f32 %v1018_v14, %v831_v62 }
 0x386   :  { %v836_v5 = vmul.f32 %v1020_v19, %v831_v62 }
 0x387   :  { %v848_v38 = vadd.f32 %v1434_v8, %v834_v3  ;;  %v851_v42 = vadd.f32 %v826_v54, %v791_v63  ;;  %v847_v45 = vadd.f32 %v1438_v21, %v833_v4  ;;  %v849_v48 = vadd.f32 %v1441_v22, %v835_v2 }
 0x388   :  { %v850_v34 = vadd.f32 %v1430_v7, %v836_v5 }
 0x389   :  { %v856_v6 = vrot.slane %v851_v42, %v1414_v1 }
 0x38b   :  { %v859_v10 = vadd.f32 %v856_v6, %v848_v38  ;;  %v858_v15 = vadd.f32 %v856_v6, %v847_v45  ;;  %v860_v12 = vadd.f32 %v856_v6, %v849_v48  ;;  %v861_v13 = vadd.f32 %v856_v6, %v850_v34 }
 0x38d   :  { %v863_v16 = vmax.f32 %v859_v10, 0.0  ;;  %v862_v14 = vmax.f32 %v858_v15, 0.0  ;;  %v864_v17 = vmax.f32 %v860_v12, 0.0  ;;  %v865_v18 = vmax.f32 %v861_v13, 0.0 }
 0x38f   :  { %867 = vst [vmem:[#allocation7 + $0x8] sm:$0xff] %v863_v16  ;;  %866 = vst [vmem:[#allocation7] sm:$0xff] %v862_v14 }
 0x390   :  { %868 = vst [vmem:[#allocation7 + $0x10] sm:$0xff] %v864_v17  ;;  %869 = vst [vmem:[#allocation7 + $0x18] sm:$0xff] %v865_v18 }
 0x391   :  { %1145 = shalt.err (!%p1142_p6)
}
 0x392   :  { %s1146_s21 = scalar_lea.hbm %s1510_s11, 512 }
 0x393   :  { %p1147_p7 = scmp.ne.s32.totalorder %s1510_s11, %s1146_s21  ;;  %p1150_p8 = scmp.lt.u32.totalorder %s1146_s21, %s1510_s11 }
 0x395   :  { %p1152_p9 = pnand %p1150_p8, %p1147_p7 }
 0x397   :  { %1155 = shalt.err (!%p1152_p9)
}
 0x398   :  { %881 = dma.vmem_to_hbm [thread:$0]  %s876_s8, 512, %s1510_s11, [#allocation4], %s1163_s27, %s1163_s27, %s1164_s28  }
 0x399   :  { %1160 = dma.done.wait [#allocation4], 512  }
 0x39a   :  { %1161 = vsyncadd [#allocation4], 4294966784 }
 0x39b   :  { %885 = vsyncpa [#allocation3], 1 }
 0x39c   :  { %886 = vsyncpa [#allocation6], 1 }
 0x39d   :  { %887 = vsyncpa [#allocation4], 1 }

</bundles_post_ra>
